<compile_context>
chip_gen: v7x
topology: tpu7x:2x2x1
jax: 0.10.0
libtpu: 0.0.40
codegen_flags: <defaults>
</compile_context>

<pallas_src>
import functools

import jax
import jax.numpy as jnp
from jax import lax
from jax.experimental import pallas as pl
from jax.experimental.pallas import tpu as pltpu


def net_forward_kernel(
    x_ref,     # [N, Dp]   mm_dtype  LSTM inputs, time-major (N = T*bb), ones col appended
    ev_ref,    # [N, 4]    f32       columns: target dt, count_self, count_nonself, mask
    wih_ref,   # [Dp, 4H]  mm_dtype  input weights^T with (b_ih + b_hh) row folded in
    whh_ref,   # [H, 4H]   mm_dtype  recurrent weights^T
    wc_ref,    # [H, 1]    f32       fused mlp + time_linear weights
    scal_ref,  # [7] SMEM  f32: [b_comb, w_s, b_s, exp(b_s)/w_s, w_ns, b_ns, exp(b_ns)/w_ns]
    out_ref,   # [1, 2]    f32 out:  [sum of masked -loglik (self), (nonself)]
    *,
    seq_len,   # static python int T
):
    N, Dp = x_ref.shape
    H = whh_ref.shape[0]
    T = seq_len
    BB = N // T

    # ---- input projection for ALL timesteps in one MXU matmul (bias folded) ----
    gx = jnp.dot(x_ref[...], wih_ref[...],
                 preferred_element_type=jnp.float32)               # [N, 4H] f32

    # Hoist loop-invariant loads.
    whh = whh_ref[...]
    mm_dtype = whh.dtype

    # ---- LSTM recurrence: fully unrolled, state kept in registers ----
    h = jnp.zeros((BB, H), jnp.float32)
    c = jnp.zeros((BB, H), jnp.float32)
    h_list = []
    for t in range(T):  # T static and small -> full unroll (LLO can overlap)
        gates = gx[t * BB:(t + 1) * BB, :] + jnp.dot(
            h.astype(mm_dtype), whh, preferred_element_type=jnp.float32)  # [BB, 4H]
        # One sigmoid + one tanh over the full 128-lane gates vreg, then slice
        # (PyTorch LSTM gate order: i, f, g, o).  3 EUP passes/step, not 5.
        sig = jax.nn.sigmoid(gates)
        tnh = jnp.tanh(gates)
        i_g = sig[:, 0 * H:1 * H]
        f_g = sig[:, 1 * H:2 * H]
        o_g = sig[:, 3 * H:4 * H]
        g_g = tnh[:, 2 * H:3 * H]
        c = f_g * c + i_g * g_g
        h = o_g * jnp.tanh(c)
        h_list.append(h)

    # ---- head: one post-loop matmul, completely off the recurrence chain ----
    hs = jnp.concatenate(h_list, axis=0)                           # [N, H] time-major
    past = jnp.dot(hs, wc_ref[...],
                   preferred_element_type=jnp.float32) + scal_ref[0]  # [N, 1]

    # ---- point-process log-likelihood losses (rows match ev layout) ----
    ev = ev_ref[...]
    tgt = ev[:, 0:1]
    c1 = ev[:, 1:2]
    c2 = ev[:, 2:3]
    msk = ev[:, 3:4]

    e_past = jnp.exp(past)  # shared across both losses

    def neg_masked_sum(w, b, k, count):
        cur = w * tgt
        event_ll = past + cur + b
        # exp(past+b)/w - exp(past+cur+b)/w == k * e_past * (1 - exp(cur)), k = exp(b)/w
        non_event_ll = k * e_past * (1.0 - jnp.exp(cur))
        return jnp.sum(-(count * event_ll + non_event_ll) * msk).reshape(1, 1)

    ls = neg_masked_sum(scal_ref[1], scal_ref[2], scal_ref[3], c1)
    lns = neg_masked_sum(scal_ref[4], scal_ref[5], scal_ref[6], c2)
    out_ref[...] = jnp.concatenate([ls, lns], axis=1)              # one [1,2] store


def _matmul_dtype():
    """bf16 matmul operands on bf16-native parts (v6e/v7x); f32 otherwise."""
    try:
        kind = jax.devices()[0].device_kind.lower()
    except Exception:
        return jnp.float32
    if ("v6" in kind) or ("v7" in kind) or ("tpu7" in kind):
        return jnp.bfloat16
    return jnp.float32


def init_params(key, hid_dim, mlp_dim, feature_dim):
    din = 1 + feature_dim + 2
    ks = jax.random.split(key, 8)
    s = 1.0 / jnp.sqrt(hid_dim).astype(jnp.float32)
    sm = 1.0 / jnp.sqrt(mlp_dim).astype(jnp.float32)
    return dict(
        w_ih=jax.random.uniform(ks[0], (4 * hid_dim, din), jnp.float32, -s, s),
        w_hh=jax.random.uniform(ks[1], (4 * hid_dim, hid_dim), jnp.float32, -s, s),
        b_ih=jax.random.uniform(ks[2], (4 * hid_dim,), jnp.float32, -s, s),
        b_hh=jax.random.uniform(ks[3], (4 * hid_dim,), jnp.float32, -s, s),
        w_mlp=jax.random.uniform(ks[4], (mlp_dim, hid_dim), jnp.float32, -s, s),
        b_mlp=jax.random.uniform(ks[5], (mlp_dim,), jnp.float32, -s, s),
        w_time=jax.random.uniform(ks[6], (1, mlp_dim), jnp.float32, -sm, sm),
        b_time=jax.random.uniform(ks[7], (1,), jnp.float32, -sm, sm),
        w_self=jnp.float32(0.1), b_self=jnp.float32(0.1),
        w_nonself=jnp.float32(0.1), b_nonself=jnp.float32(0.1),
    )


@jax.jit
def net_forward(params, b_inter_t, b_marks, b_mask, b_features):
    B, S = b_inter_t.shape
    T = S - 1
    H = params["w_hh"].shape[1]

    mm_dtype = _matmul_dtype()

    # ---- glue: LSTM input with a ones column for the folded LSTM bias ----
    x = jnp.concatenate(
        [b_inter_t[:, :T, None], b_features[:, :T],
         b_marks[:, :T].astype(jnp.float32),
         jnp.ones((B, T, 1), jnp.float32)], axis=-1)               # [B, T, Dp]
    Dp = x.shape[-1]

    # Megacore split only when each block has >= a full sublane tile of rows;
    # on single-TC v5e/v6e (and at B=2 anywhere) nb=1 avoids extra grid steps.
    nb = 2 if (B >= 16 and B % 2 == 0) else 1
    bb = B // nb
    N = T * bb

    # Time-major per block: row (t, b_local) -> t * bb + b_local.
    x_blk = (jnp.transpose(x, (1, 0, 2))
             .reshape(T, nb, bb, Dp)
             .transpose(1, 0, 2, 3)
             .reshape(nb, N, Dp)).astype(mm_dtype)

    wih_aug = jnp.concatenate(
        [jnp.transpose(params["w_ih"]),                            # [Din, 4H]
         (params["b_ih"] + params["b_hh"])[None, :]], axis=0       # bias row
    ).astype(mm_dtype)                                             # [Dp, 4H]
    whh_t = jnp.transpose(params["w_hh"]).astype(mm_dtype)         # [H, 4H]

    # Fuse MLP + time_linear (dropout identity in eval):
    # past = h @ (w_mlp.T @ w_time.T) + (b_mlp @ w_time.T + b_time)
    w_comb = (params["w_mlp"].T @ params["w_time"].T).astype(jnp.float32)  # [H, 1]
    b_comb = (params["b_mlp"] @ params["w_time"].T + params["b_time"])[0]

    # Per-event tensors, same time-major row order as x: cols = tgt, c1, c2, mask.
    ev = jnp.stack(
        [b_inter_t[:, 1:],
         b_marks[:, 1:, 0].astype(jnp.float32),
         b_marks[:, 1:, 1].astype(jnp.float32),
         b_mask[:, 1:].astype(jnp.float32)], axis=-1)              # [B, T, 4]
    ev_blk = (jnp.transpose(ev, (1, 0, 2))
              .reshape(T, nb, bb, 4)
              .transpose(1, 0, 2, 3)
              .reshape(nb, N, 4))

    w_s, b_s = params["w_self"], params["b_self"]
    w_ns, b_ns = params["w_nonself"], params["b_nonself"]
    scal = jnp.stack([b_comb, w_s, b_s, jnp.exp(b_s) / w_s,
                      w_ns, b_ns, jnp.exp(b_ns) / w_ns]).astype(jnp.float32)

    out = pl.pallas_call(
        functools.partial(net_forward_kernel, seq_len=T),
        out_shape=jax.ShapeDtypeStruct((nb, 1, 2), jnp.float32),
        grid=(nb,),
        in_specs=[
            pl.BlockSpec((None, N, Dp), lambda i: (i, 0, 0)),      # x (time-major)
            pl.BlockSpec((None, N, 4), lambda i: (i, 0, 0)),       # ev
            pl.BlockSpec(wih_aug.shape, lambda i: (0, 0)),         # wih (+bias row)
            pl.BlockSpec(whh_t.shape, lambda i: (0, 0)),           # whh
            pl.BlockSpec(w_comb.shape, lambda i: (0, 0)),          # fused head weight
            pl.BlockSpec(memory_space=pltpu.MemorySpace.SMEM),     # scalars
        ],
        out_specs=pl.BlockSpec((None, 1, 2), lambda i: (i, 0, 0)),
        compiler_params=pltpu.CompilerParams(
            dimension_semantics=("parallel",)),
    )(x_blk, ev_blk, wih_aug, whh_t, w_comb, scal)

    # PyTorch .mean() over [B, T, 1] includes masked positions.
    n = jnp.float32(T * B)
    sums = jnp.sum(out, axis=(0, 1))                               # [2]
    return sums[0] / n, sums[1] / n


def net_forward_ref(params, b_inter_t, b_marks, b_mask, b_features):
    """Pure-JAX reference matching the PyTorch forward (dropout in eval)."""
    H = params["w_hh"].shape[1]
    x = jnp.concatenate(
        [b_inter_t[:, :-1, None], b_features[:, :-1],
         b_marks[:, :-1].astype(jnp.float32)], axis=-1)            # [B, T, Din]
    w_ih, w_hh = params["w_ih"], params["w_hh"]
    b = params["b_ih"] + params["b_hh"]

    def step(carry, x_t):
        h, c = carry
        gates = x_t @ w_ih.T + h @ w_hh.T + b
        i = jax.nn.sigmoid(gates[:, :H])
        f = jax.nn.sigmoid(gates[:, H:2 * H])
        g = jnp.tanh(gates[:, 2 * H:3 * H])
        o = jax.nn.sigmoid(gates[:, 3 * H:])
        c = f * c + i * g
        h = o * jnp.tanh(c)
        return (h, c), h

    B = x.shape[0]
    init = (jnp.zeros((B, H), jnp.float32), jnp.zeros((B, H), jnp.float32))
    _, hs = lax.scan(step, init, jnp.transpose(x, (1, 0, 2)))
    hs = jnp.transpose(hs, (1, 0, 2))                              # [B, T, H]
    mlp = hs @ params["w_mlp"].T + params["b_mlp"]
    past = mlp @ params["w_time"].T + params["b_time"]             # [B, T, 1]
    tgt = b_inter_t[:, 1:, None]
    c1 = b_marks[:, 1:, 0:1].astype(jnp.float32)
    c2 = b_marks[:, 1:, 1:2].astype(jnp.float32)
    mask = b_mask[:, 1:, None].astype(jnp.float32)

    def ll(w, bb, count):
        cur = w * tgt
        event = past + cur + bb
        non_event = jnp.exp(past + bb) / w - jnp.exp(past + cur + bb) / w
        return count * event + non_event

    ls = -ll(params["w_self"], params["b_self"], c1) * mask
    lns = -ll(params["w_nonself"], params["b_nonself"], c2) * mask
    return ls.mean(), lns.mean()


if __name__ == "__main__":
    B, S, F, HID, MLP = 2, 8, 4, 32, 32
    key = jax.random.PRNGKey(0)
    kp, k1, k2, k3, k4 = jax.random.split(key, 5)

    params = init_params(kp, HID, MLP, F)
    b_inter_t = jax.random.uniform(k1, (B, S), jnp.float32, 0.0, 2.0)
    mark0 = jax.random.bernoulli(k2, 0.5, (B, S))
    b_marks = jnp.stack([mark0, ~mark0], axis=-1).astype(jnp.float32)   # [B, S, 2]
    b_mask = (jax.random.uniform(k4, (B, S)) > 0.3).astype(jnp.float32)
    b_features = jax.random.normal(k3, (B, S, F), jnp.float32)

    loss_self, loss_nonself = net_forward(params, b_inter_t, b_marks, b_mask, b_features)
    jax.block_until_ready((loss_self, loss_nonself))

    ls_ref, lns_ref = net_forward_ref(params, b_inter_t, b_marks, b_mask, b_features)
    assert jnp.allclose(loss_self, ls_ref, rtol=5e-2, atol=5e-2), (loss_self, ls_ref)
    assert jnp.allclose(loss_nonself, lns_ref, rtol=5e-2, atol=5e-2), (loss_nonself, lns_ref)

    print("KERNEL_OK")
</pallas_src>

<mosaic_0001>
module attributes {stable_mosaic.version = 11 : i64} {
  func.func @net_forward_kernel(%arg0: i32, %arg1: memref<1x14x8xf32, #tpu.memory_space<vmem>>, %arg2: memref<1x14x4xf32, #tpu.memory_space<vmem>>, %arg3: memref<8x128xf32, #tpu.memory_space<vmem>>, %arg4: memref<32x128xf32, #tpu.memory_space<vmem>>, %arg5: memref<32x1xf32, #tpu.memory_space<vmem>>, %arg6: memref<7xf32, #tpu.memory_space<smem>>, %arg7: memref<1x1x2xf32, #tpu.memory_space<vmem>>) attributes {dimension_semantics = [#tpu.dimension_semantics<parallel>], iteration_bounds = array<i64: 1>, scalar_prefetch = 0 : i64, scratch_operands = 0 : i64, tpu.core_type = #tpu.core_type<tc>, window_params = [{transform_indices = @transform_0, window_bounds = array<i64: 1, 14, 8>}, {transform_indices = @transform_1, window_bounds = array<i64: 1, 14, 4>}, {pipeline_mode = #tpu.pipeline_mode<synchronous>, transform_indices = @transform_2, window_bounds = array<i64: 8, 128>}, {pipeline_mode = #tpu.pipeline_mode<synchronous>, transform_indices = @transform_3, window_bounds = array<i64: 32, 128>}, {pipeline_mode = #tpu.pipeline_mode<synchronous>, transform_indices = @transform_4, window_bounds = array<i64: 32, 1>}, {transform_indices = @transform_5, window_bounds = array<i64: 7>}, {transform_indices = @transform_6, window_bounds = array<i64: 1, 1, 2>}]} {
    %c0 = arith.constant 0 : index
    %c0_0 = arith.constant 0 : index
    %c0_1 = arith.constant 0 : index
    %0 = vector.load %arg1[%c0, %c0_0, %c0_1] : memref<1x14x8xf32, #tpu.memory_space<vmem>>, vector<1x14x8xf32>
    %1 = vector.shape_cast %0 : vector<1x14x8xf32> to vector<14x8xf32>
    %c0_2 = arith.constant 0 : index
    %c0_3 = arith.constant 0 : index
    %2 = vector.load %arg3[%c0_2, %c0_3] : memref<8x128xf32, #tpu.memory_space<vmem>>, vector<8x128xf32>
    %cst = arith.constant dense<0.000000e+00> : vector<14x128xf32>
    %3 = tpu.matmul %1, %2, %cst {dimension_numbers = #tpu.dot_dimension_numbers<[1], [0], [0], [1], [0, 0, 1, 1], [], []>} : vector<14x8xf32>, vector<8x128xf32>, vector<14x128xf32> -> vector<14x128xf32>
    %c0_4 = arith.constant 0 : index
    %c0_5 = arith.constant 0 : index
    %4 = vector.load %arg4[%c0_4, %c0_5] : memref<32x128xf32, #tpu.memory_space<vmem>>, vector<32x128xf32>
    %cst_6 = arith.constant 0.000000e+00 : f32
    %5 = vector.broadcast %cst_6 : f32 to vector<2x32xf32>
    %cst_7 = arith.constant 0.000000e+00 : f32
    %6 = vector.broadcast %cst_7 : f32 to vector<2x32xf32>
    %7 = vector.extract_strided_slice %3 {offsets = [0, 0], sizes = [2, 128], strides = [1, 1]} : vector<14x128xf32> to vector<2x128xf32>
    %cst_8 = arith.constant dense<0.000000e+00> : vector<2x128xf32>
    %8 = tpu.matmul %5, %4, %cst_8 {dimension_numbers = #tpu.dot_dimension_numbers<[1], [0], [0], [1], [0, 0, 1, 1], [], []>} : vector<2x32xf32>, vector<32x128xf32>, vector<2x128xf32> -> vector<2x128xf32>
    %9 = arith.addf %7, %8 : vector<2x128xf32>
    %10 = arith.negf %9 : vector<2x128xf32>
    %11 = math.exp %10 : vector<2x128xf32>
    %cst_9 = arith.constant 1.000000e+00 : f32
    %12 = vector.broadcast %cst_9 : f32 to vector<2x128xf32>
    %13 = arith.addf %12, %11 : vector<2x128xf32>
    %14 = arith.divf %12, %13 : vector<2x128xf32>
    %15 = math.tanh %9 : vector<2x128xf32>
    %16 = vector.extract_strided_slice %14 {offsets = [0, 0], sizes = [2, 32], strides = [1, 1]} : vector<2x128xf32> to vector<2x32xf32>
    %17 = vector.extract_strided_slice %14 {offsets = [0, 32], sizes = [2, 32], strides = [1, 1]} : vector<2x128xf32> to vector<2x32xf32>
    %18 = vector.extract_strided_slice %14 {offsets = [0, 96], sizes = [2, 32], strides = [1, 1]} : vector<2x128xf32> to vector<2x32xf32>
    %19 = vector.extract_strided_slice %15 {offsets = [0, 64], sizes = [2, 32], strides = [1, 1]} : vector<2x128xf32> to vector<2x32xf32>
    %20 = arith.mulf %17, %6 : vector<2x32xf32>
    %21 = arith.mulf %16, %19 : vector<2x32xf32>
    %22 = arith.addf %20, %21 : vector<2x32xf32>
    %23 = math.tanh %22 : vector<2x32xf32>
    %24 = arith.mulf %18, %23 : vector<2x32xf32>
    %25 = vector.extract_strided_slice %3 {offsets = [2, 0], sizes = [2, 128], strides = [1, 1]} : vector<14x128xf32> to vector<2x128xf32>
    %cst_10 = arith.constant dense<0.000000e+00> : vector<2x128xf32>
    %26 = tpu.matmul %24, %4, %cst_10 {dimension_numbers = #tpu.dot_dimension_numbers<[1], [0], [0], [1], [0, 0, 1, 1], [], []>} : vector<2x32xf32>, vector<32x128xf32>, vector<2x128xf32> -> vector<2x128xf32>
    %27 = arith.addf %25, %26 : vector<2x128xf32>
    %28 = arith.negf %27 : vector<2x128xf32>
    %29 = math.exp %28 : vector<2x128xf32>
    %cst_11 = arith.constant 1.000000e+00 : f32
    %30 = vector.broadcast %cst_11 : f32 to vector<2x128xf32>
    %31 = arith.addf %30, %29 : vector<2x128xf32>
    %32 = arith.divf %30, %31 : vector<2x128xf32>
    %33 = math.tanh %27 : vector<2x128xf32>
    %34 = vector.extract_strided_slice %32 {offsets = [0, 0], sizes = [2, 32], strides = [1, 1]} : vector<2x128xf32> to vector<2x32xf32>
    %35 = vector.extract_strided_slice %32 {offsets = [0, 32], sizes = [2, 32], strides = [1, 1]} : vector<2x128xf32> to vector<2x32xf32>
    %36 = vector.extract_strided_slice %32 {offsets = [0, 96], sizes = [2, 32], strides = [1, 1]} : vector<2x128xf32> to vector<2x32xf32>
    %37 = vector.extract_strided_slice %33 {offsets = [0, 64], sizes = [2, 32], strides = [1, 1]} : vector<2x128xf32> to vector<2x32xf32>
    %38 = arith.mulf %35, %22 : vector<2x32xf32>
    %39 = arith.mulf %34, %37 : vector<2x32xf32>
    %40 = arith.addf %38, %39 : vector<2x32xf32>
    %41 = math.tanh %40 : vector<2x32xf32>
    %42 = arith.mulf %36, %41 : vector<2x32xf32>
    %43 = vector.extract_strided_slice %3 {offsets = [4, 0], sizes = [2, 128], strides = [1, 1]} : vector<14x128xf32> to vector<2x128xf32>
    %cst_12 = arith.constant dense<0.000000e+00> : vector<2x128xf32>
    %44 = tpu.matmul %42, %4, %cst_12 {dimension_numbers = #tpu.dot_dimension_numbers<[1], [0], [0], [1], [0, 0, 1, 1], [], []>} : vector<2x32xf32>, vector<32x128xf32>, vector<2x128xf32> -> vector<2x128xf32>
    %45 = arith.addf %43, %44 : vector<2x128xf32>
    %46 = arith.negf %45 : vector<2x128xf32>
    %47 = math.exp %46 : vector<2x128xf32>
    %cst_13 = arith.constant 1.000000e+00 : f32
    %48 = vector.broadcast %cst_13 : f32 to vector<2x128xf32>
    %49 = arith.addf %48, %47 : vector<2x128xf32>
    %50 = arith.divf %48, %49 : vector<2x128xf32>
    %51 = math.tanh %45 : vector<2x128xf32>
    %52 = vector.extract_strided_slice %50 {offsets = [0, 0], sizes = [2, 32], strides = [1, 1]} : vector<2x128xf32> to vector<2x32xf32>
    %53 = vector.extract_strided_slice %50 {offsets = [0, 32], sizes = [2, 32], strides = [1, 1]} : vector<2x128xf32> to vector<2x32xf32>
    %54 = vector.extract_strided_slice %50 {offsets = [0, 96], sizes = [2, 32], strides = [1, 1]} : vector<2x128xf32> to vector<2x32xf32>
    %55 = vector.extract_strided_slice %51 {offsets = [0, 64], sizes = [2, 32], strides = [1, 1]} : vector<2x128xf32> to vector<2x32xf32>
    %56 = arith.mulf %53, %40 : vector<2x32xf32>
    %57 = arith.mulf %52, %55 : vector<2x32xf32>
    %58 = arith.addf %56, %57 : vector<2x32xf32>
    %59 = math.tanh %58 : vector<2x32xf32>
    %60 = arith.mulf %54, %59 : vector<2x32xf32>
    %61 = vector.extract_strided_slice %3 {offsets = [6, 0], sizes = [2, 128], strides = [1, 1]} : vector<14x128xf32> to vector<2x128xf32>
    %cst_14 = arith.constant dense<0.000000e+00> : vector<2x128xf32>
    %62 = tpu.matmul %60, %4, %cst_14 {dimension_numbers = #tpu.dot_dimension_numbers<[1], [0], [0], [1], [0, 0, 1, 1], [], []>} : vector<2x32xf32>, vector<32x128xf32>, vector<2x128xf32> -> vector<2x128xf32>
    %63 = arith.addf %61, %62 : vector<2x128xf32>
    %64 = arith.negf %63 : vector<2x128xf32>
    %65 = math.exp %64 : vector<2x128xf32>
    %cst_15 = arith.constant 1.000000e+00 : f32
    %66 = vector.broadcast %cst_15 : f32 to vector<2x128xf32>
    %67 = arith.addf %66, %65 : vector<2x128xf32>
    %68 = arith.divf %66, %67 : vector<2x128xf32>
    %69 = math.tanh %63 : vector<2x128xf32>
    %70 = vector.extract_strided_slice %68 {offsets = [0, 0], sizes = [2, 32], strides = [1, 1]} : vector<2x128xf32> to vector<2x32xf32>
    %71 = vector.extract_strided_slice %68 {offsets = [0, 32], sizes = [2, 32], strides = [1, 1]} : vector<2x128xf32> to vector<2x32xf32>
    %72 = vector.extract_strided_slice %68 {offsets = [0, 96], sizes = [2, 32], strides = [1, 1]} : vector<2x128xf32> to vector<2x32xf32>
    %73 = vector.extract_strided_slice %69 {offsets = [0, 64], sizes = [2, 32], strides = [1, 1]} : vector<2x128xf32> to vector<2x32xf32>
    %74 = arith.mulf %71, %58 : vector<2x32xf32>
    %75 = arith.mulf %70, %73 : vector<2x32xf32>
    %76 = arith.addf %74, %75 : vector<2x32xf32>
    %77 = math.tanh %76 : vector<2x32xf32>
    %78 = arith.mulf %72, %77 : vector<2x32xf32>
    %79 = vector.extract_strided_slice %3 {offsets = [8, 0], sizes = [2, 128], strides = [1, 1]} : vector<14x128xf32> to vector<2x128xf32>
    %cst_16 = arith.constant dense<0.000000e+00> : vector<2x128xf32>
    %80 = tpu.matmul %78, %4, %cst_16 {dimension_numbers = #tpu.dot_dimension_numbers<[1], [0], [0], [1], [0, 0, 1, 1], [], []>} : vector<2x32xf32>, vector<32x128xf32>, vector<2x128xf32> -> vector<2x128xf32>
    %81 = arith.addf %79, %80 : vector<2x128xf32>
    %82 = arith.negf %81 : vector<2x128xf32>
    %83 = math.exp %82 : vector<2x128xf32>
    %cst_17 = arith.constant 1.000000e+00 : f32
    %84 = vector.broadcast %cst_17 : f32 to vector<2x128xf32>
    %85 = arith.addf %84, %83 : vector<2x128xf32>
    %86 = arith.divf %84, %85 : vector<2x128xf32>
    %87 = math.tanh %81 : vector<2x128xf32>
    %88 = vector.extract_strided_slice %86 {offsets = [0, 0], sizes = [2, 32], strides = [1, 1]} : vector<2x128xf32> to vector<2x32xf32>
    %89 = vector.extract_strided_slice %86 {offsets = [0, 32], sizes = [2, 32], strides = [1, 1]} : vector<2x128xf32> to vector<2x32xf32>
    %90 = vector.extract_strided_slice %86 {offsets = [0, 96], sizes = [2, 32], strides = [1, 1]} : vector<2x128xf32> to vector<2x32xf32>
    %91 = vector.extract_strided_slice %87 {offsets = [0, 64], sizes = [2, 32], strides = [1, 1]} : vector<2x128xf32> to vector<2x32xf32>
    %92 = arith.mulf %89, %76 : vector<2x32xf32>
    %93 = arith.mulf %88, %91 : vector<2x32xf32>
    %94 = arith.addf %92, %93 : vector<2x32xf32>
    %95 = math.tanh %94 : vector<2x32xf32>
    %96 = arith.mulf %90, %95 : vector<2x32xf32>
    %97 = vector.extract_strided_slice %3 {offsets = [10, 0], sizes = [2, 128], strides = [1, 1]} : vector<14x128xf32> to vector<2x128xf32>
    %cst_18 = arith.constant dense<0.000000e+00> : vector<2x128xf32>
    %98 = tpu.matmul %96, %4, %cst_18 {dimension_numbers = #tpu.dot_dimension_numbers<[1], [0], [0], [1], [0, 0, 1, 1], [], []>} : vector<2x32xf32>, vector<32x128xf32>, vector<2x128xf32> -> vector<2x128xf32>
    %99 = arith.addf %97, %98 : vector<2x128xf32>
    %100 = arith.negf %99 : vector<2x128xf32>
    %101 = math.exp %100 : vector<2x128xf32>
    %cst_19 = arith.constant 1.000000e+00 : f32
    %102 = vector.broadcast %cst_19 : f32 to vector<2x128xf32>
    %103 = arith.addf %102, %101 : vector<2x128xf32>
    %104 = arith.divf %102, %103 : vector<2x128xf32>
    %105 = math.tanh %99 : vector<2x128xf32>
    %106 = vector.extract_strided_slice %104 {offsets = [0, 0], sizes = [2, 32], strides = [1, 1]} : vector<2x128xf32> to vector<2x32xf32>
    %107 = vector.extract_strided_slice %104 {offsets = [0, 32], sizes = [2, 32], strides = [1, 1]} : vector<2x128xf32> to vector<2x32xf32>
    %108 = vector.extract_strided_slice %104 {offsets = [0, 96], sizes = [2, 32], strides = [1, 1]} : vector<2x128xf32> to vector<2x32xf32>
    %109 = vector.extract_strided_slice %105 {offsets = [0, 64], sizes = [2, 32], strides = [1, 1]} : vector<2x128xf32> to vector<2x32xf32>
    %110 = arith.mulf %107, %94 : vector<2x32xf32>
    %111 = arith.mulf %106, %109 : vector<2x32xf32>
    %112 = arith.addf %110, %111 : vector<2x32xf32>
    %113 = math.tanh %112 : vector<2x32xf32>
    %114 = arith.mulf %108, %113 : vector<2x32xf32>
    %115 = vector.extract_strided_slice %3 {offsets = [12, 0], sizes = [2, 128], strides = [1, 1]} : vector<14x128xf32> to vector<2x128xf32>
    %cst_20 = arith.constant dense<0.000000e+00> : vector<2x128xf32>
    %116 = tpu.matmul %114, %4, %cst_20 {dimension_numbers = #tpu.dot_dimension_numbers<[1], [0], [0], [1], [0, 0, 1, 1], [], []>} : vector<2x32xf32>, vector<32x128xf32>, vector<2x128xf32> -> vector<2x128xf32>
    %117 = arith.addf %115, %116 : vector<2x128xf32>
    %118 = arith.negf %117 : vector<2x128xf32>
    %119 = math.exp %118 : vector<2x128xf32>
    %cst_21 = arith.constant 1.000000e+00 : f32
    %120 = vector.broadcast %cst_21 : f32 to vector<2x128xf32>
    %121 = arith.addf %120, %119 : vector<2x128xf32>
    %122 = arith.divf %120, %121 : vector<2x128xf32>
    %123 = math.tanh %117 : vector<2x128xf32>
    %124 = vector.extract_strided_slice %122 {offsets = [0, 0], sizes = [2, 32], strides = [1, 1]} : vector<2x128xf32> to vector<2x32xf32>
    %125 = vector.extract_strided_slice %122 {offsets = [0, 32], sizes = [2, 32], strides = [1, 1]} : vector<2x128xf32> to vector<2x32xf32>
    %126 = vector.extract_strided_slice %122 {offsets = [0, 96], sizes = [2, 32], strides = [1, 1]} : vector<2x128xf32> to vector<2x32xf32>
    %127 = vector.extract_strided_slice %123 {offsets = [0, 64], sizes = [2, 32], strides = [1, 1]} : vector<2x128xf32> to vector<2x32xf32>
    %128 = arith.mulf %125, %112 : vector<2x32xf32>
    %129 = arith.mulf %124, %127 : vector<2x32xf32>
    %130 = arith.addf %128, %129 : vector<2x32xf32>
    %131 = math.tanh %130 : vector<2x32xf32>
    %132 = arith.mulf %126, %131 : vector<2x32xf32>
    %133 = tpu.concatenate %24, %42, %60, %78, %96, %114, %132 in 0 : vector<2x32xf32>, vector<2x32xf32>, vector<2x32xf32>, vector<2x32xf32>, vector<2x32xf32>, vector<2x32xf32>, vector<2x32xf32> -> vector<14x32xf32>
    %c0_22 = arith.constant 0 : index
    %c0_23 = arith.constant 0 : index
    %134 = vector.load %arg5[%c0_22, %c0_23] : memref<32x1xf32, #tpu.memory_space<vmem>>, vector<32x1xf32>
    %cst_24 = arith.constant dense<0.000000e+00> : vector<14x1xf32>
    %135 = tpu.matmul %133, %134, %cst_24 {dimension_numbers = #tpu.dot_dimension_numbers<[1], [0], [0], [1], [0, 0, 1, 1], [], []>} : vector<14x32xf32>, vector<32x1xf32>, vector<14x1xf32> -> vector<14x1xf32>
    %c0_25 = arith.constant 0 : index
    %136 = memref.load %arg6[%c0_25] : memref<7xf32, #tpu.memory_space<smem>>
    %137 = vector.broadcast %136 : f32 to vector<14x1xf32>
    %138 = arith.addf %135, %137 : vector<14x1xf32>
    %c0_26 = arith.constant 0 : index
    %c0_27 = arith.constant 0 : index
    %c0_28 = arith.constant 0 : index
    %139 = vector.load %arg2[%c0_26, %c0_27, %c0_28] : memref<1x14x4xf32, #tpu.memory_space<vmem>>, vector<1x14x4xf32>
    %140 = vector.shape_cast %139 : vector<1x14x4xf32> to vector<14x4xf32>
    %141 = vector.extract_strided_slice %140 {offsets = [0, 0], sizes = [14, 1], strides = [1, 1]} : vector<14x4xf32> to vector<14x1xf32>
    %142 = vector.extract_strided_slice %140 {offsets = [0, 1], sizes = [14, 1], strides = [1, 1]} : vector<14x4xf32> to vector<14x1xf32>
    %143 = vector.extract_strided_slice %140 {offsets = [0, 2], sizes = [14, 1], strides = [1, 1]} : vector<14x4xf32> to vector<14x1xf32>
    %144 = vector.extract_strided_slice %140 {offsets = [0, 3], sizes = [14, 1], strides = [1, 1]} : vector<14x4xf32> to vector<14x1xf32>
    %145 = math.exp %138 : vector<14x1xf32>
    %c1 = arith.constant 1 : index
    %146 = memref.load %arg6[%c1] : memref<7xf32, #tpu.memory_space<smem>>
    %c2 = arith.constant 2 : index
    %147 = memref.load %arg6[%c2] : memref<7xf32, #tpu.memory_space<smem>>
    %c3 = arith.constant 3 : index
    %148 = memref.load %arg6[%c3] : memref<7xf32, #tpu.memory_space<smem>>
    %149 = vector.broadcast %146 : f32 to vector<14x1xf32>
    %150 = arith.mulf %149, %141 : vector<14x1xf32>
    %151 = arith.addf %138, %150 : vector<14x1xf32>
    %152 = vector.broadcast %147 : f32 to vector<14x1xf32>
    %153 = arith.addf %151, %152 : vector<14x1xf32>
    %154 = vector.broadcast %148 : f32 to vector<14x1xf32>
    %155 = arith.mulf %154, %145 : vector<14x1xf32>
    %156 = math.exp %150 : vector<14x1xf32>
    %cst_29 = arith.constant 1.000000e+00 : f32
    %157 = vector.broadcast %cst_29 : f32 to vector<14x1xf32>
    %158 = arith.subf %157, %156 : vector<14x1xf32>
    %159 = arith.mulf %155, %158 : vector<14x1xf32>
    %160 = arith.mulf %142, %153 : vector<14x1xf32>
    %161 = arith.addf %160, %159 : vector<14x1xf32>
    %cst_30 = arith.constant 0.000000e+00 : f32
    %162 = vector.broadcast %cst_30 : f32 to vector<14x1xf32>
    %163 = arith.subf %162, %161 : vector<14x1xf32>
    %164 = arith.mulf %163, %144 : vector<14x1xf32>
    %165 = vector.shape_cast %164 : vector<14x1xf32> to vector<1x14x1xf32>
    %cst_31 = arith.constant dense<0.000000e+00> : vector<1xf32>
    %166 = vector.multi_reduction <add>, %165, %cst_31 [1, 2] : vector<1x14x1xf32> to vector<1xf32>
    %167 = vector.shape_cast %166 : vector<1xf32> to vector<1x1x1xf32>
    %168 = vector.extract %167[0, 0, 0] : f32 from vector<1x1x1xf32>
    %169 = vector.broadcast %168 : f32 to vector<1x1xf32>
    %c4 = arith.constant 4 : index
    %170 = memref.load %arg6[%c4] : memref<7xf32, #tpu.memory_space<smem>>
    %c5 = arith.constant 5 : index
    %171 = memref.load %arg6[%c5] : memref<7xf32, #tpu.memory_space<smem>>
    %c6 = arith.constant 6 : index
    %172 = memref.load %arg6[%c6] : memref<7xf32, #tpu.memory_space<smem>>
    %173 = vector.broadcast %170 : f32 to vector<14x1xf32>
    %174 = arith.mulf %173, %141 : vector<14x1xf32>
    %175 = arith.addf %138, %174 : vector<14x1xf32>
    %176 = vector.broadcast %171 : f32 to vector<14x1xf32>
    %177 = arith.addf %175, %176 : vector<14x1xf32>
    %178 = vector.broadcast %172 : f32 to vector<14x1xf32>
    %179 = arith.mulf %178, %145 : vector<14x1xf32>
    %180 = math.exp %174 : vector<14x1xf32>
    %cst_32 = arith.constant 1.000000e+00 : f32
    %181 = vector.broadcast %cst_32 : f32 to vector<14x1xf32>
    %182 = arith.subf %181, %180 : vector<14x1xf32>
    %183 = arith.mulf %179, %182 : vector<14x1xf32>
    %184 = arith.mulf %143, %177 : vector<14x1xf32>
    %185 = arith.addf %184, %183 : vector<14x1xf32>
    %cst_33 = arith.constant 0.000000e+00 : f32
    %186 = vector.broadcast %cst_33 : f32 to vector<14x1xf32>
    %187 = arith.subf %186, %185 : vector<14x1xf32>
    %188 = arith.mulf %187, %144 : vector<14x1xf32>
    %189 = vector.shape_cast %188 : vector<14x1xf32> to vector<1x14x1xf32>
    %cst_34 = arith.constant dense<0.000000e+00> : vector<1xf32>
    %190 = vector.multi_reduction <add>, %189, %cst_34 [1, 2] : vector<1x14x1xf32> to vector<1xf32>
    %191 = vector.shape_cast %190 : vector<1xf32> to vector<1x1x1xf32>
    %192 = vector.extract %191[0, 0, 0] : f32 from vector<1x1x1xf32>
    %193 = vector.broadcast %192 : f32 to vector<1x1xf32>
    %194 = tpu.concatenate %169, %193 in 1 : vector<1x1xf32>, vector<1x1xf32> -> vector<1x2xf32>
    %c0_35 = arith.constant 0 : index
    %c0_36 = arith.constant 0 : index
    %c0_37 = arith.constant 0 : index
    %195 = vector.load %arg7[%c0_35, %c0_36, %c0_37] : memref<1x1x2xf32, #tpu.memory_space<vmem>>, vector<1x1x2xf32>
    %196 = vector.shape_cast %195 : vector<1x1x2xf32> to vector<1x2xf32>
    %197 = vector.shape_cast %194 : vector<1x2xf32> to vector<1x1x2xf32>
    tpu.vector_store %arg7[%c0_35, %c0_36, %c0_37], %197 {strides = array<i32>} : memref<1x1x2xf32, #tpu.memory_space<vmem>>, vector<1x1x2xf32>,
    return
  }
  func.func @transform_0(%arg0: i32) -> (i32, i32, i32) {
    %c0_i32 = arith.constant 0 : i32
    %c0_i32_0 = arith.constant 0 : i32
    %c0_i32_1 = arith.constant 0 : i32
    return %arg0, %c0_i32, %c0_i32_0 : i32, i32, i32
  }
  func.func @transform_1(%arg0: i32) -> (i32, i32, i32) {
    %c0_i32 = arith.constant 0 : i32
    %c0_i32_0 = arith.constant 0 : i32
    %c0_i32_1 = arith.constant 0 : i32
    return %arg0, %c0_i32, %c0_i32_0 : i32, i32, i32
  }
  func.func @transform_2(%arg0: i32) -> (i32, i32) {
    %c0_i32 = arith.constant 0 : i32
    %c0_i32_0 = arith.constant 0 : i32
    %c0_i32_1 = arith.constant 0 : i32
    return %c0_i32, %c0_i32_0 : i32, i32
  }
  func.func @transform_3(%arg0: i32) -> (i32, i32) {
    %c0_i32 = arith.constant 0 : i32
    %c0_i32_0 = arith.constant 0 : i32
    %c0_i32_1 = arith.constant 0 : i32
    return %c0_i32, %c0_i32_0 : i32, i32
  }
  func.func @transform_4(%arg0: i32) -> (i32, i32) {
    %c0_i32 = arith.constant 0 : i32
    %c0_i32_0 = arith.constant 0 : i32
    %c0_i32_1 = arith.constant 0 : i32
    return %c0_i32, %c0_i32_0 : i32, i32
  }
  func.func @transform_5(%arg0: i32) -> i32 {
    %c0_i32 = arith.constant 0 : i32
    %c0_i32_0 = arith.constant 0 : i32
    return %c0_i32 : i32
  }
  func.func @transform_6(%arg0: i32) -> (i32, i32, i32) {
    %c0_i32 = arith.constant 0 : i32
    %c0_i32_0 = arith.constant 0 : i32
    %c0_i32_1 = arith.constant 0 : i32
    return %arg0, %c0_i32, %c0_i32_0 : i32, i32, i32
  }
}

</mosaic_0001>

<bundles_post_ra>
// kernel: net_forward.1
= control target key start
LH: loop header
LB: loop body
LE: loop exit
PB: predicated region body
PF: predicated region fallthrough
CT: control target
= control target key end

     0   :  { %11 = vsyncpa [#allocation3], 0  ;;  %s1653_s0 = inlined_call_operand.vmem [shape: f32[1,14,8], index: 0, kind: input, shape index: {}]   ;;  %s1654_s1 = inlined_call_operand.vmem [shape: f32[1,14,4], index: 1, kind: input, shape index: {}]   ;;  %s1655_s2 = inlined_call_operand.vmem [shape: f32[8,128], index: 2, kind: input, shape index: {}]   ;;  %s1656_s3 = inlined_call_operand.vmem [shape: f32[32,128], index: 3, kind: input, shape index: {}]   ;;  %s1657_s4 = inlined_call_operand.vmem [shape: f32[32,1], index: 4, kind: input, shape index: {}]   ;;  %s1658_s5 = inlined_call_operand.vmem [shape: f32[7], index: 5, kind: input, shape index: {}]   ;;  %s1659_s6 = inlined_call_operand.vmem [shape: f32[1,1,2], index: 6, kind: output, shape index: {}]  }
   0x1   :  { %s28_s23 = sshll.u32 %s1658_s5, 4  ;;  %s29_s23 = int_to_ptr.vmem [resolvable:$true] %s28_s23 }
   0x2   :  { %s1416_s24 = scalar_lea.vmem %s29_s23, 16  ;;  %p1421_p1 = scmp.lt.s32.totalorder %s29_s23, %s29_s23 }
   0x3   :  { %p1417_p0 = scmp.ne.s32.totalorder %s29_s23, %s1416_s24  ;;  %p1422_p2 = scmp.lt.s32.totalorder %s1416_s24, %s1416_s24 }
   0x5   :  { %p1423_p3 = por %p1422_p2, %p1421_p1 }
   0x7   :  { %p1424_p4 = pnand %p1423_p3, %p1417_p0 }
   0x9   :  { %1427 = shalt.err (!%p1424_p4)
}
   0xa   :  { %s1430_s25 = smov [#allocation2]  }
   0xb   :  { %31 = dma.vmem_to_smem %s29_s23, 16, %s1430_s25, [#allocation3]  }
   0xc   :  { %1428 = dma.done.wait [#allocation3], 16  }
   0xd   :  { %1429 = vsyncadd [#allocation3], 4294967280 }
   0xe   :  { %35 = sfence }
   0xf   :  { %v121_v0 = vld [vmem:[%s1656_s3] sm:$0xff]  ;;  %v122_v1 = vld [vmem:[%s1656_s3 + $0x8] sm:$0xff]  ;;  %vm39_vm0 = vcmask 64512   ;;  %v1431_v3 = vmov 0.0|0.0   ;;  %v123_v6 = vld [vmem:[%s1656_s3 + $0x10] sm:$0xff]  ;;  %vm1432_vm1 = vmmov 0  }
  0x10   :  { %v38_v2 = vld [vmem:[%s1655_s2] sm:$0xff]  ;;  %1284 = vmatprep.subr.bf16.mxu1 %v1431_v3  ;;  %v1488_v4 = vpack.c.bf16 %v122_v1, %v121_v0  ;;  %v124_v7 = vld [vmem:[%s1656_s3 + $0x18] sm:$0xff]  ;;  %v37_v8 = vld [vmem:[%s1653_s0 + $0x8] sm:$0x3f]  ;;  %v1433_v10 = vmov 0.0   ;;  %s1435_s3 = smov 32  }
  0x11   :  { %1191 = vmatprep.subr.mxu0 %v38_v2  ;;  %v36_v5 = vld [vmem:[%s1653_s0] sm:$0xff]  ;;  %v1503_v9 = vpack.c.bf16 %v124_v7, %v123_v6  ;;  %1204 = vmatprep.mubr.msk.f32.mxu1 %vm1432_vm1, %v1433_v10  ;;  %s1434_s0 = smov 64   ;;  %vm125_vm2 = vcmask 261120   ;;  %vm861_vm3 = vcmask 1041408   ;;  %vm863_vm4 = vcmask 1043456   ;;  %s1436_s25 = smov 126  }
  0x12   :  { %1192 = vmatpush3.msra.mxu0 %v38_v2  ;;  %1193 = vmatprep.mubr.msk.f32.mxu0 %vm39_vm0, %v36_v5  ;;  %vm865_vm5 = vcmask 1045504   ;;  %s1141_s26 = sld [smem:[#allocation2 + $0x1]]  ;;  %s1144_s27 = sld [smem:[#allocation2 + $0x4]]  ;;  %vm1030_vm6 = vcmask 5120   ;;  %vm1028_vm7 = vcmask 7168   ;;  %vm1117_vm8 = vcmask 8192  }
  0x13   :  { %1286 = vmatpush3.bf16.msra.mxu1 %v1488_v4  ;;  %1194 = vmatmul.mubr.msk.f32.vlgmr.msra.gmra.mrb[0].mxu0 %vm39_vm0, %v37_v8  ;;  %s873_s28 = sld [smem:[#allocation2]]  ;;  %s1142_s29 = sld [smem:[#allocation2 + $0x2]] }
  0x14   :  { %1287 = vmatprep.subr.bf16.mxu1 %v1431_v3  ;;  %1290 = vmatprep.subr.bf16.mxu0 %v1431_v3  ;;  %s1143_s5 = sld [smem:[#allocation2 + $0x3]]  ;;  %s1437_s30 = smov 1  }
  0x15   :  { %1215 = vmatprep.mubr.msk.f32.mxu0 %vm1432_vm1, %v1433_v10  ;;  %1292 = vmatpush3.bf16.msra.mxu0 %v1488_v4  ;;  %s1146_s7 = sld [smem:[#allocation2 + $0x6]]  ;;  %s1438_s8 = smov 2  }
  0x16   :  { %1293 = vmatprep.subr.bf16.mxu0 %v1431_v3  ;;  %s1439_s9 = smov 127  }
  0x17   :  { %1289 = vmatpush3.bf16.msra.mxu1 %v1503_v9 }
  0x18   :  { %1296 = vmatprep.subr.bf16.mxu1 %v1431_v3 }
  0x19   :  { %1295 = vmatpush3.bf16.msra.mxu0 %v1503_v9 }
  0x1a   :  { %1205 = vmatmul.mubr.f32.vlgmr.msra.gmra.mrb[0].mxu1 %v1433_v10  ;;  %1302 = vmatprep.subr.bf16.mxu0 %v1431_v3 }
  0x1b   :  { %1298 = vmatpush3.bf16.msra.mxu1 %v1488_v4  ;;  %1226 = vmatprep.mubr.msk.f32.mxu1 %vm1432_vm1, %v1433_v10 }
  0x1c   :  { %1299 = vmatprep.subr.bf16.mxu1 %v1431_v3 }
  0x1f   :  { %1301 = vmatpush3.bf16.msra.mxu1 %v1503_v9 }
  0x20   :  { %1308 = vmatprep.subr.bf16.mxu1 %v1431_v3 }
  0xe6   :  { %v1524_v11 = vpop.f32.mrb[0].mxu0 }
  0xe7   :  { %v1526_v12 = vpop.f32.mrb[1].mxu0 }
  0xed   :  { %v195_v13 = vpop.f32.mrb[0].mxu1 }
  0xee   :  { %v199_v14 = vadd.f32 %v195_v13, %v1526_v12  ;;  %v1206_v15 = vpop.f32.mrb[1].mxu1 }
  0xf0   :  { %1348 = vtanh.f32 %v199_v14  ;;  %v1126_v17 = vmul.f32 -1.442695, %v199_v14 }
  0xf2   :  { %1350 = vpow2.f32 %v1126_v17 }
  0xfa   :  { %v1349_v16 = vpop.eup %1348 }
  0xfb   :  { %209 = vrot.lane.b32.xlu0 %v1349_v16, %s1434_s0 }
  0xfc   :  { %v1351_v18 = vpop.eup %1350 }
  0xfd   :  { %v203_v19 = vadd.f32 1.0, %v1351_v18 }
  0xff   :  { %1352 = vrcp.f32 %v203_v19 }
 0x109   :  { %v1353_v20 = vpop.eup %1352 }
 0x10a   :  { %v207_v23 = vmul.f32 0.0, %v1353_v20 }
 0x16d   :  { %v210_v21 = vpop.permute.xlu0 %209 }
 0x16e   :  { %v212_v22 = vmul.f32 %v1353_v20, %v210_v21 }
 0x170   :  { %214 = vrot.lane.b32.xlu0 %v212_v22, %s1435_s3 }
 0x1e2   :  { %v215_v24 = vpop.permute.xlu0 %214 }
 0x1e3   :  { %v217_v25 = vadd.f32 %v215_v24, %v207_v23 }
 0x1e5   :  { %1354 = vtanh.f32 %v217_v25  ;;  %v311_v41 = vrot.slane %v217_v25, 6 }
 0x1ef   :  { %v1355_v26 = vpop.eup %1354 }
 0x1f0   :  { %220 = vrot.lane.b32.xlu1 %v1355_v26, %s1434_s0 }
 0x262   :  { %v221_v27 = vpop.permute.xlu1 %220 }
 0x263   :  { %v1532_v28 = vmul.f32 %v1353_v20, %v221_v27 }
 0x265   :  { %225 = vrot.lane.b32.xlu1 %v1532_v28, %s1435_s3 }
 0x2d7   :  { %v226_v29 = vpop.permute.xlu1 %225 }
 0x2d8   :  { %1216 = vmatmul.mubr.msk.f32.vlgmr.msra.gmra.mrb[2].mxu0 %vm125_vm2, %v226_v29 }
 0x2d9   :  { %1304 = vmatpush3.bf16.msra.mxu0 %v1488_v4  ;;  %1237 = vmatprep.mubr.msk.f32.mxu0 %vm1432_vm1, %v1433_v10 }
 0x2da   :  { %1305 = vmatprep.subr.bf16.mxu0 %v1431_v3 }
 0x2dd   :  { %1307 = vmatpush3.bf16.msra.mxu0 %v1503_v9 }
 0x2de   :  { %1314 = vmatprep.subr.bf16.mxu0 %v1431_v3 }
 0x3ab   :  { %v295_v30 = vpop.f32.mrb[2].mxu0 }
 0x3ac   :  { %v300_v31 = vrot.slane %v295_v30, 6  ;;  %v1217_v32 = vpop.f32.mrb[3].mxu0 }
 0x3ae   :  { %v302_v33 = vadd.f32 %v300_v31, %v1526_v12 }
 0x3b0   :  { %1356 = vtanh.f32 %v302_v33  ;;  %v1128_v35 = vmul.f32 -1.442695, %v302_v33 }
 0x3b2   :  { %1358 = vpow2.f32 %v1128_v35 }
 0x3ba   :  { %v1357_v34 = vpop.eup %1356 }
 0x3bb   :  { %315 = vrot.lane.b32.xlu0 %v1357_v34, %s1434_s0 }
 0x3bc   :  { %v1359_v36 = vpop.eup %1358 }
 0x3bd   :  { %v306_v37 = vadd.f32 1.0, %v1359_v36 }
 0x3bf   :  { %1360 = vrcp.f32 %v306_v37 }
 0x3c9   :  { %v1361_v38 = vpop.eup %1360 }
 0x3ca   :  { %v313_v42 = vmul.f32 %v1361_v38, %v311_v41 }
 0x42d   :  { %v316_v39 = vpop.permute.xlu0 %315 }
 0x42e   :  { %v318_v40 = vmul.f32 %v1361_v38, %v316_v39 }
 0x430   :  { %320 = vrot.lane.b32.xlu1 %v318_v40, %s1435_s3 }
 0x4a2   :  { %v321_v43 = vpop.permute.xlu1 %320 }
 0x4a3   :  { %v323_v44 = vadd.f32 %v321_v43, %v313_v42 }
 0x4a5   :  { %1362 = vtanh.f32 %v323_v44  ;;  %v418_v61 = vrot.slane %v323_v44, 6 }
 0x4af   :  { %v1363_v45 = vpop.eup %1362 }
 0x4b0   :  { %326 = vrot.lane.b32.xlu0 %v1363_v45, %s1434_s0 }
 0x522   :  { %v327_v46 = vpop.permute.xlu0 %326 }
 0x523   :  { %v329_v47 = vmul.f32 %v1361_v38, %v327_v46 }
 0x525   :  { %v331_v48 = vrot.slane %v329_v47, 2  ;;  %v862_v6 = vsel %vm861_vm3, %v1532_v28, %v329_v47 }
 0x527   :  { %332 = vrot.lane.b32.xlu1 %v331_v48, %s1435_s3 }
 0x599   :  { %v333_v49 = vpop.permute.xlu1 %332 }
 0x59a   :  { %1227 = vmatmul.mubr.msk.f32.vlgmr.msra.gmra.mrb[2].mxu1 %vm125_vm2, %v333_v49 }
 0x59b   :  { %1310 = vmatpush3.bf16.msra.mxu1 %v1488_v4  ;;  %1248 = vmatprep.mubr.msk.f32.mxu1 %vm1432_vm1, %v1433_v10 }
 0x59c   :  { %1311 = vmatprep.subr.bf16.mxu1 %v1431_v3 }
 0x59f   :  { %1313 = vmatpush3.bf16.msra.mxu1 %v1503_v9 }
 0x5a0   :  { %1320 = vmatprep.subr.bf16.mxu1 %v1431_v3 }
 0x66d   :  { %v402_v50 = vpop.f32.mrb[2].mxu1 }
 0x66e   :  { %v407_v51 = vrot.slane %v402_v50, 4  ;;  %v1228_v52 = vpop.f32.mrb[3].mxu1 }
 0x670   :  { %v409_v53 = vadd.f32 %v407_v51, %v1526_v12 }
 0x672   :  { %1364 = vtanh.f32 %v409_v53  ;;  %v1130_v55 = vmul.f32 -1.442695, %v409_v53 }
 0x674   :  { %1366 = vpow2.f32 %v1130_v55 }
 0x67c   :  { %v1365_v54 = vpop.eup %1364 }
 0x67d   :  { %422 = vrot.lane.b32.xlu0 %v1365_v54, %s1434_s0 }
 0x67e   :  { %v1367_v56 = vpop.eup %1366 }
 0x67f   :  { %v413_v57 = vadd.f32 1.0, %v1367_v56 }
 0x681   :  { %1368 = vrcp.f32 %v413_v57 }
 0x68b   :  { %v1369_v58 = vpop.eup %1368 }
 0x68c   :  { %v420_v62 = vmul.f32 %v1369_v58, %v418_v61 }
 0x6ef   :  { %v423_v59 = vpop.permute.xlu0 %422 }
 0x6f0   :  { %v425_v60 = vmul.f32 %v1369_v58, %v423_v59 }
 0x6f2   :  { %427 = vrot.lane.b32.xlu1 %v425_v60, %s1435_s3 }
 0x764   :  { %v428_v63 = vpop.permute.xlu1 %427 }
 0x765   :  { %v430_v0 = vadd.f32 %v428_v63, %v420_v62 }
 0x767   :  { %1370 = vtanh.f32 %v430_v0  ;;  %v525_v25 = vrot.slane %v430_v0, 6 }
 0x771   :  { %v1371_v1 = vpop.eup %1370 }
 0x772   :  { %433 = vrot.lane.b32.xlu0 %v1371_v1, %s1434_s0 }
 0x7e4   :  { %v434_v2 = vpop.permute.xlu0 %433 }
 0x7e5   :  { %v436_v5 = vmul.f32 %v1369_v58, %v434_v2 }
 0x7e7   :  { %v438_v7 = vrot.slane %v436_v5, 4  ;;  %v864_v8 = vsel %vm863_vm4, %v862_v6, %v436_v5 }
 0x7e9   :  { %439 = vrot.lane.b32.xlu1 %v438_v7, %s1435_s3 }
 0x85b   :  { %v440_v13 = vpop.permute.xlu1 %439 }
 0x85c   :  { %1238 = vmatmul.mubr.msk.f32.vlgmr.msra.gmra.mrb[4].mxu0 %vm125_vm2, %v440_v13 }
 0x85d   :  { %1316 = vmatpush3.bf16.msra.mxu0 %v1488_v4  ;;  %1259 = vmatprep.mubr.msk.f32.mxu0 %vm1432_vm1, %v1433_v10 }
 0x85e   :  { %1317 = vmatprep.subr.bf16.mxu0 %v1431_v3 }
 0x861   :  { %1319 = vmatpush3.bf16.msra.mxu0 %v1503_v9 }
 0x92f   :  { %v509_v14 = vpop.f32.mrb[4].mxu0 }
 0x930   :  { %v514_v15 = vrot.slane %v509_v14, 2  ;;  %v1239_v16 = vpop.f32.mrb[5].mxu0 }
 0x932   :  { %v516_v17 = vadd.f32 %v514_v15, %v1526_v12 }
 0x934   :  { %1372 = vtanh.f32 %v516_v17  ;;  %v1132_v19 = vmul.f32 -1.442695, %v516_v17 }
 0x936   :  { %1374 = vpow2.f32 %v1132_v19 }
 0x93e   :  { %v1373_v18 = vpop.eup %1372 }
 0x93f   :  { %529 = vrot.lane.b32.xlu0 %v1373_v18, %s1434_s0 }
 0x940   :  { %v1375_v20 = vpop.eup %1374 }
 0x941   :  { %v520_v21 = vadd.f32 1.0, %v1375_v20 }
 0x943   :  { %1376 = vrcp.f32 %v520_v21 }
 0x94d   :  { %v1377_v22 = vpop.eup %1376 }
 0x94e   :  { %v527_v26 = vmul.f32 %v1377_v22, %v525_v25  ;;  %v869_v25 = vld [vmem:[%s1657_s4] sm:$0xff] }
 0x9b1   :  { %v530_v23 = vpop.permute.xlu0 %529 }
 0x9b2   :  { %v532_v24 = vmul.f32 %v1377_v22, %v530_v23 }
 0x9b4   :  { %534 = vrot.lane.b32.xlu1 %v532_v24, %s1435_s3 }
 0xa26   :  { %v535_v27 = vpop.permute.xlu1 %534 }
 0xa27   :  { %v537_v28 = vadd.f32 %v535_v27, %v527_v26  ;;  %v870_v26 = vld [vmem:[%s1657_s4 + $0x8] sm:$0xff]  ;;  %v871_v27 = vld [vmem:[%s1657_s4 + $0x10] sm:$0xff] }
 0xa29   :  { %1378 = vtanh.f32 %v537_v28 }
 0xa33   :  { %v1379_v12 = vpop.eup %1378 }
 0xa34   :  { %540 = vrot.lane.b32.xlu0 %v1379_v12, %s1434_s0  ;;  %v872_v12 = vld [vmem:[%s1657_s4 + $0x18] sm:$0xff] }
 0xaa6   :  { %v541_v29 = vpop.permute.xlu0 %540 }
 0xaa7   :  { %v543_v30 = vmul.f32 %v1377_v22, %v541_v29  ;;  %v1330_v29 = vpack.c.bf16 %v872_v12, %v871_v27 }
 0xaa9   :  { %v545_v31 = vrot.slane %v543_v30, 6  ;;  %v1573_v32 = vsel %vm865_vm5, %v864_v8, %v543_v30 }
 0xaab   :  { %546 = vrot.lane.b32.xlu1 %v545_v31, %s1435_s3 }
 0xb1d   :  { %v547_v33 = vpop.permute.xlu1 %546 }
 0xb1e   :  { %1249 = vmatmul.mubr.msk.f32.vlgmr.msra.gmra.mrb[4].mxu1 %vm125_vm2, %v547_v33 }
 0xb1f   :  { %1322 = vmatpush3.bf16.msra.mxu1 %v1488_v4  ;;  %1270 = vmatprep.mubr.msk.f32.mxu1 %vm1432_vm1, %v1433_v10 }
 0xb20   :  { %1323 = vmatprep.subr.bf16.mxu1 %v1431_v3  ;;  %v629_v3 = vrot.slane %v537_v28, 6  ;;  %v1326_v28 = vpack.c.bf16 %v870_v26, %v869_v25 }
 0xb22   :  { %1327 = vmatprep.subr.bf16.mxu0 %v1326_v28 }
 0xb23   :  { %1325 = vmatpush3.bf16.msra.mxu1 %v1503_v9 }
 0xbf1   :  { %v616_v34 = vpop.f32.mrb[4].mxu1 }
 0xbf2   :  { %v620_v35 = vadd.f32 %v1524_v11, %v616_v34  ;;  %v1250_v36 = vpop.f32.mrb[5].mxu1 }
 0xbf3   :  { %v1624_v36 = vld [vmem:[%s1654_s1 + $0x8] sm:$0x3f] }
 0xbf4   :  { %1380 = vtanh.f32 %v620_v35  ;;  %v1134_v38 = vmul.f32 -1.442695, %v620_v35 }
 0xbf6   :  { %1382 = vpow2.f32 %v1134_v38  ;;  %v969_v38 = vstv %s1141_s26 }
 0xbfe   :  { %v1381_v37 = vpop.eup %1380 }
 0xbff   :  { %633 = vrot.lane.b32.xlu0 %v1381_v37, %s1434_s0  ;;  %v1629_v37 = vld [vmem:[%s1654_s1] sm:$0xff]  ;;  %s1145_s1 = sld [smem:[#allocation2 + $0x5]] }
 0xc00   :  { %v1383_v39 = vpop.eup %1382 }
 0xc01   :  { %v624_v40 = vadd.f32 1.0, %v1383_v39  ;;  %v1046_v39 = vstv %s1144_s27 }
 0xc03   :  { %1384 = vrcp.f32 %v624_v40  ;;  %v971_v40 = vmul.f32 %v969_v38, %v1624_v36 }
 0xc0d   :  { %v1385_v4 = vpop.eup %1384 }
 0xc0e   :  { %v631_v9 = vmul.f32 %v1385_v4, %v629_v3  ;;  %v982_v3 = vmul.f32 1.442695, %v971_v40 }
 0xc71   :  { %v634_v41 = vpop.permute.xlu0 %633 }
 0xc72   :  { %v636_v10 = vmul.f32 %v1385_v4, %v634_v41  ;;  %v1048_v41 = vmul.f32 %v1046_v39, %v1624_v36 }
 0xc74   :  { %638 = vrot.lane.b32.xlu1 %v636_v10, %s1435_s3  ;;  %v1047_v10 = vmul.f32 %v1046_v39, %v1629_v37 }
 0xce6   :  { %v639_v42 = vpop.permute.xlu1 %638 }
 0xce7   :  { %v641_v43 = vadd.f32 %v639_v42, %v631_v9  ;;  %v874_v9 = vstv %s873_s28 }
 0xce9   :  { %1386 = vtanh.f32 %v641_v43  ;;  %v735_v59 = vrot.slane %v641_v43, 6  ;;  %v1059_v43 = vmul.f32 1.442695, %v1048_v41 }
 0xcf3   :  { %v1387_v44 = vpop.eup %1386 }
 0xcf4   :  { %644 = vrot.lane.b32.xlu0 %v1387_v44, %s1434_s0 }
 0xd66   :  { %v645_v45 = vpop.permute.xlu0 %644 }
 0xd67   :  { %v1586_v46 = vmul.f32 %v1385_v4, %v645_v45  ;;  %v970_v4 = vmul.f32 %v969_v38, %v1629_v37  ;;  %v1057_v45 = vmul.f32 1.442695, %v1047_v10 }
 0xd69   :  { %649 = vrot.lane.b32.xlu1 %v1586_v46, %s1435_s3  ;;  %v980_v42 = vmul.f32 1.442695, %v970_v4 }
 0xddb   :  { %v650_v47 = vpop.permute.xlu1 %649 }
 0xddc   :  { %1260 = vmatmul.mubr.msk.f32.vlgmr.msra.gmra.mrb[6].mxu0 %vm125_vm2, %v650_v47 }
 0xddd   :  { %1329 = vmatpush3.bf16.msra.mxu0 %v1326_v28 }
 0xdde   :  { %1331 = vmatprep.subr.bf16.mxu0 %v1330_v29 }
 0xde1   :  { %1333 = vmatpush3.bf16.msra.mxu0 %v1330_v29 }
 0xeaf   :  { %v719_v48 = vpop.f32.mrb[6].mxu0 }
 0xeb0   :  { %v724_v49 = vrot.slane %v719_v48, 6  ;;  %v1261_v50 = vpop.f32.mrb[7].mxu0 }
 0xeb2   :  { %v726_v51 = vadd.f32 %v1524_v11, %v724_v49  ;;  %v974_v49 = vstv %s1142_s29 }
 0xeb4   :  { %1388 = vtanh.f32 %v726_v51  ;;  %v1136_v53 = vmul.f32 -1.442695, %v726_v51 }
 0xeb6   :  { %1390 = vpow2.f32 %v1136_v53 }
 0xebe   :  { %v1389_v52 = vpop.eup %1388 }
 0xebf   :  { %739 = vrot.lane.b32.xlu0 %v1389_v52, %s1434_s0 }
 0xec0   :  { %v1391_v54 = vpop.eup %1390 }
 0xec1   :  { %v730_v55 = vadd.f32 1.0, %v1391_v54 }
 0xec3   :  { %1392 = vrcp.f32 %v730_v55 }
 0xecd   :  { %v1393_v56 = vpop.eup %1392 }
 0xece   :  { %v737_v60 = vmul.f32 %v1393_v56, %v735_v59 }
 0xf31   :  { %v740_v57 = vpop.permute.xlu0 %739 }
 0xf32   :  { %v742_v58 = vmul.f32 %v1393_v56, %v740_v57 }
 0xf34   :  { %744 = vrot.lane.b32.xlu1 %v742_v58, %s1435_s3  ;;  %v1051_v58 = vstv %s1145_s1 }
 0xfa6   :  { %v745_v61 = vpop.permute.xlu1 %744 }
 0xfa7   :  { %v747_v62 = vadd.f32 %v745_v61, %v737_v60 }
 0xfa9   :  { %1394 = vtanh.f32 %v747_v62  ;;  %v842_v21 = vrot.slane %v747_v62, 6 }
 0xfb3   :  { %v1395_v63 = vpop.eup %1394 }
 0xfb4   :  { %750 = vrot.lane.b32.xlu0 %v1395_v63, %s1434_s0 }
0x1026   :  { %v751_v0 = vpop.permute.xlu0 %750 }
0x1027   :  { %v753_v1 = vmul.f32 %v1393_v56, %v751_v0  ;;  %v977_v0 = vstv %s1143_s5 }
0x1029   :  { %v755_v2 = vrot.slane %v753_v1, 2  ;;  %v867_v33 = vsel %vm861_vm3, %v1586_v46, %v753_v1 }
0x102b   :  { %756 = vrot.lane.b32.xlu1 %v755_v2, %s1435_s3 }
0x109d   :  { %v757_v5 = vpop.permute.xlu1 %756 }
0x109e   :  { %1271 = vmatmul.mubr.msk.f32.vlgmr.msra.gmra.mrb[6].mxu1 %vm125_vm2, %v757_v5 }
0x1171   :  { %v826_v6 = vpop.f32.mrb[6].mxu1 }
0x1172   :  { %v831_v7 = vrot.slane %v826_v6, 4  ;;  %v1272_v8 = vpop.f32.mrb[7].mxu1 }
0x1174   :  { %v833_v13 = vadd.f32 %v1524_v11, %v831_v7  ;;  %v1054_v7 = vstv %s1146_s7 }
0x1176   :  { %1396 = vtanh.f32 %v833_v13  ;;  %v1138_v15 = vmul.f32 -1.442695, %v833_v13 }
0x1178   :  { %1398 = vpow2.f32 %v1138_v15 }
0x1180   :  { %v1397_v14 = vpop.eup %1396 }
0x1181   :  { %846 = vrot.lane.b32.xlu0 %v1397_v14, %s1434_s0 }
0x1182   :  { %v1399_v16 = vpop.eup %1398 }
0x1183   :  { %v837_v17 = vadd.f32 1.0, %v1399_v16 }
0x1185   :  { %1400 = vrcp.f32 %v837_v17 }
0x118f   :  { %v1401_v18 = vpop.eup %1400 }
0x1190   :  { %v844_v22 = vmul.f32 %v1401_v18, %v842_v21 }
0x11f3   :  { %v847_v19 = vpop.permute.xlu0 %846 }
0x11f4   :  { %v849_v20 = vmul.f32 %v1401_v18, %v847_v19 }
0x11f6   :  { %851 = vrot.lane.b32.xlu1 %v849_v20, %s1435_s3 }
0x11fa   :  { %877 = vrot.lane.b32.xlu1 %v1573_v32, %s1435_s3 }
0x11fe   :  { %1012 = vrot.lane.b32.xlu1 %v1629_v37, %s1436_s25 }
0x1268   :  { %v852_v11 = vpop.permute.xlu1 %851 }
0x1269   :  { %v854_v23 = vadd.f32 %v852_v11, %v844_v22 }
0x126b   :  { %1402 = vtanh.f32 %v854_v23 }
0x126c   :  { %v878_v24 = vpop.permute.xlu1 %877  ;;  %1404 = vpow2.f32 %v982_v3 }
0x126d   :  { %1281 = vmatprep.mubr.msk.f32.mxu0 %vm125_vm2, %v878_v24  ;;  %1406 = vpow2.f32 %v980_v42 }
0x126e   :  { %1408 = vpow2.f32 %v1059_v43 }
0x126f   :  { %1410 = vpow2.f32 %v1057_v45 }
0x1270   :  { %v1013_v23 = vpop.permute.xlu1 %1012 }
0x1275   :  { %v1403_v30 = vpop.eup %1402 }
0x1276   :  { %857 = vrot.lane.b32.xlu0 %v1403_v30, %s1434_s0  ;;  %v1405_v61 = vpop.eup %1404 }
0x1277   :  { %v1407_v62 = vpop.eup %1406  ;;  %v985_v2 = vsub.f32 1.0, %v1405_v61 }
0x1278   :  { %v1409_v63 = vpop.eup %1408  ;;  %v984_v6 = vsub.f32 1.0, %v1407_v62 }
0x1279   :  { %v1411_v1 = vpop.eup %1410  ;;  %v1062_v17 = vsub.f32 1.0, %v1409_v63 }
0x127a   :  { %v1061_v20 = vsub.f32 1.0, %v1411_v1 }
0x12e8   :  { %v858_v31 = vpop.permute.xlu0 %857 }
0x12e9   :  { %v860_v32 = vmul.f32 %v1401_v18, %v858_v31 }
0x12eb   :  { %v868_v34 = vsel %vm863_vm4, %v867_v33, %v860_v32 }
0x12ec   :  { %879 = vrot.lane.b32.xlu0 %v868_v34, %s1435_s3 }
0x12f0   :  { %1014 = vrot.lane.b32.xlu0 %v1624_v36, %s1436_s25 }
0x135e   :  { %v880_v35 = vpop.permute.xlu0 %879 }
0x135f   :  { %1282 = vmatmul.mubr.msk.f32.vlgmr.msra.gmra.mrb[8].mxu0 %vm125_vm2, %v880_v35 }
0x1362   :  { %v1015_v11 = vpop.permute.xlu0 %1014 }
0x1432   :  { %v1283_v44 = vpop.f32.mrb[8].mxu0 }
0x1433   :  { %v957_v46 = vadd.f32 %v1283_v44, %v874_v9  ;;  %v951_v47 = vpop.f32.mrb[9].mxu0 }
0x1434   :  { %v952_v48 = vadd.f32 %v951_v47, %v874_v9 }
0x1435   :  { %v964_v50 = vmul.f32 1.442695, %v957_v46  ;;  %v973_v51 = vadd.f32 %v971_v40, %v957_v46  ;;  %v1050_v54 = vadd.f32 %v1048_v41, %v957_v46 }
0x1436   :  { %v962_v52 = vmul.f32 1.442695, %v952_v48  ;;  %v972_v53 = vadd.f32 %v970_v4, %v952_v48  ;;  %v1049_v56 = vadd.f32 %v1047_v10, %v952_v48 }
0x1437   :  { %1412 = vpow2.f32 %v964_v50  ;;  %v976_v55 = vadd.f32 %v974_v49, %v973_v51  ;;  %v1053_v59 = vadd.f32 %v1051_v58, %v1050_v54 }
0x1438   :  { %1414 = vpow2.f32 %v962_v52  ;;  %v975_v57 = vadd.f32 %v974_v49, %v972_v53  ;;  %v1052_v60 = vadd.f32 %v1051_v58, %v1049_v56 }
0x1439   :  { %992 = vrot.lane.b32.xlu0 %v976_v55, %s1437_s30 }
0x143a   :  { %990 = vrot.lane.b32.xlu1 %v975_v57, %s1437_s30 }
0x143d   :  { %1069 = vrot.lane.b32.xlu0 %v1053_v59, %s1438_s8 }
0x143e   :  { %1067 = vrot.lane.b32.xlu1 %v1052_v60, %s1438_s8 }
0x1441   :  { %v1413_v5 = vpop.eup %1412 }
0x1442   :  { %v1415_v8 = vpop.eup %1414  ;;  %v979_v13 = vmul.f32 %v1413_v5, %v977_v0  ;;  %v1056_v16 = vmul.f32 %v1413_v5, %v1054_v7 }
0x1443   :  { %v978_v14 = vmul.f32 %v1415_v8, %v977_v0  ;;  %v1055_v19 = vmul.f32 %v1415_v8, %v1054_v7 }
0x1444   :  { %v987_v15 = vmul.f32 %v985_v2, %v979_v13  ;;  %v1064_v21 = vmul.f32 %v1062_v17, %v1056_v16 }
0x1445   :  { %v986_v18 = vmul.f32 %v984_v6, %v978_v14  ;;  %v1063_v22 = vmul.f32 %v1061_v20, %v1055_v19 }
0x1446   :  { %1002 = vrot.lane.b32.xlu0 %v987_v15, %s1437_s30 }
0x1447   :  { %1000 = vrot.lane.b32.xlu1 %v986_v18, %s1437_s30 }
0x144a   :  { %1079 = vrot.lane.b32.xlu0 %v1064_v21, %s1438_s8 }
0x144b   :  { %1077 = vrot.lane.b32.xlu1 %v1063_v22, %s1438_s8 }
0x144e   :  { %1089 = vrot.lane.b32.xlu0 %v1624_v36, %s1439_s9 }
0x144f   :  { %1087 = vrot.lane.b32.xlu1 %v1629_v37, %s1439_s9 }
0x14ab   :  { %v993_v24 = vpop.permute.xlu0 %992 }
0x14ac   :  { %v991_v25 = vpop.permute.xlu1 %990  ;;  %v997_v28 = vmul.f32 %v993_v24, %v1624_v36 }
0x14ad   :  { %v996_v12 = vmul.f32 %v991_v25, %v1629_v37 }
0x14af   :  { %v1070_v26 = vpop.permute.xlu0 %1069 }
0x14b0   :  { %v1068_v27 = vpop.permute.xlu1 %1067  ;;  %v1074_v33 = vmul.f32 %v1070_v26, %v1624_v36 }
0x14b1   :  { %v1073_v35 = vmul.f32 %v1068_v27, %v1629_v37 }
0x14b8   :  { %v1003_v29 = vpop.permute.xlu0 %1002 }
0x14b9   :  { %v1007_v30 = vadd.f32 %v1003_v29, %v997_v28  ;;  %v1001_v31 = vpop.permute.xlu1 %1000 }
0x14ba   :  { %v1006_v32 = vadd.f32 %v1001_v31, %v996_v12 }
0x14bb   :  { %v1009_v34 = vsub.f32 0.0, %v1007_v30 }
0x14bc   :  { %v1008_v38 = vsub.f32 0.0, %v1006_v32  ;;  %v1080_v39 = vpop.permute.xlu0 %1079 }
0x14bd   :  { %v1019_v40 = vmul.f32 %v1015_v11, %v1009_v34  ;;  %v1084_v4 = vadd.f32 %v1080_v39, %v1074_v33  ;;  %v1078_v41 = vpop.permute.xlu1 %1077 }
0x14be   :  { %v1018_v10 = vmul.f32 %v1013_v23, %v1008_v38  ;;  %v1083_v3 = vadd.f32 %v1078_v41, %v1073_v35 }
0x14bf   :  { %v1086_v9 = vsub.f32 0.0, %v1084_v4  ;;  %1024 = vrot.lane.b32.xlu0 %v1019_v40, %s1439_s9 }
0x14c0   :  { %v1085_v42 = vsub.f32 0.0, %v1083_v3  ;;  %v1090_v43 = vpop.permute.xlu0 %1089  ;;  %1022 = vrot.lane.b32.xlu1 %v1018_v10, %s1439_s9 }
0x14c1   :  { %v1094_v44 = vmul.f32 %v1090_v43, %v1086_v9  ;;  %v1088_v45 = vpop.permute.xlu1 %1087 }
0x14c2   :  { %v1093_v46 = vmul.f32 %v1088_v45, %v1085_v42 }
0x14c3   :  { %1099 = vrot.lane.b32.xlu0 %v1094_v44, %s1436_s25 }
0x14c4   :  { %1097 = vrot.lane.b32.xlu1 %v1093_v46, %s1436_s25 }
0x1531   :  { %v1025_v36 = vpop.permute.xlu0 %1024 }
0x1532   :  { %v1031_v37 = vsel %vm1030_vm6, %v1025_v36, 0.0  ;;  %v1023_v47 = vpop.permute.xlu1 %1022 }
0x1533   :  { %v1029_v48 = vsel %vm1028_vm7, %v1023_v47, 0.0 }
0x1534   :  { %v1032_v49 = vadd.f32 %v1031_v37, %v1029_v48 }
0x1535   :  { %v1100_v50 = vpop.permute.xlu0 %1099 }
0x1536   :  { %v1104_v51 = vsel %vm1030_vm6, %v1100_v50, 0.0  ;;  %1033 = vadd.xlane.f32.xlu1 %v1032_v49  ;;  %v1098_v52 = vpop.permute.xlu1 %1097 }
0x1537   :  { %v1103_v53 = vsel %vm1028_vm7, %v1098_v52, 0.0 }
0x1538   :  { %v1105_v54 = vadd.f32 %v1104_v51, %v1103_v53 }
0x153a   :  { %1106 = vadd.xlane.f32.xlu0 %v1105_v54 }
0x15c3   :  { %v1034_v55 = vpop.xlane.xlu1 %1033 }
0x15c4   :  { %v1035_v56 = vrot.slane %v1034_v55, 4 }
0x15c6   :  { %v1036_v57 = vadd.f32 %v1035_v56, %v1034_v55 }
0x15c7   :  { %v1107_v58 = vpop.xlane.xlu0 %1106 }
0x15c8   :  { %v1037_v59 = vrot.slane %v1036_v57, 2  ;;  %v1108_v60 = vrot.slane %v1107_v58, 4 }
0x15ca   :  { %v1109_v61 = vadd.f32 %v1108_v60, %v1107_v58  ;;  %v1038_v62 = vadd.f32 %v1037_v59, %v1036_v57 }
0x15cc   :  { %v1110_v63 = vrot.slane %v1109_v61, 2  ;;  %v1039_v0 = vrot.slane %v1038_v62, 1 }
0x15ce   :  { %v1111_v1 = vadd.f32 %v1110_v63, %v1109_v61  ;;  %v1040_v2 = vadd.f32 %v1039_v0, %v1038_v62 }
0x15d0   :  { %1334 = vpush %v1040_v2  ;;  %v1112_v5 = vrot.slane %v1111_v1, 1 }
0x15d2   :  { %v1113_v6 = vadd.f32 %v1112_v5, %v1111_v1 }
0x15d4   :  { %1336 = vpush %v1113_v6 }
0x1601   :  { %s1335_s10 = spop %1334 }
0x1602   :  { %v1042_v7 = vstv %s1335_s10 }
0x1605   :  { %s1337_s11 = spop %1336 }
0x1606   :  { %v1115_v8 = vstv %s1337_s11 }
0x1607   :  { %v1116_v13 = vsel %vm1028_vm7, %v1042_v7, %v1115_v8 }
0x1608   :  { %1118 = vst.msk [vmem:[%s1659_s6] sm:$0x1] %vm1117_vm8, %v1116_v13 }
0x1609   :  { %1123 = vsyncpa [#allocation3], 1 }

</bundles_post_ra>
